<compile_context>
chip_gen: v7x
topology: tpu7x:2x2x1
jax: 0.10.0
libtpu: 0.0.40
codegen_flags: <defaults>
</compile_context>

<pallas_src>
import functools

import jax
import jax.numpy as jnp
from jax.experimental import pallas as pl
from jax.experimental.pallas import tpu as pltpu

# ----------------------------- configuration -------------------------------
inferencePredictiveNetworkUseInputAllProperties = True
inferencePredictiveNetworkIndependentFCpredictions = True
numberOfHiddenLayers = 2
# TODO(synk): only the (UseInputAllProperties=True, IndependentFCpredictions=True)
# configuration of the original module is implemented here.

_FUSED_VMEM_BUDGET = 24 << 20   # conservative: fits v7x's 64 MiB physical VMEM
_MAX_VMEM_LIMIT = 48 << 20


# ------------------------------ helpers -------------------------------------
def _round_up(x, m):
    return ((x + m - 1) // m) * m


def _pick_tile(dim_padded, cap=512):
    """dim_padded is a multiple of 128; return the LARGEST multiple of 128 that
    divides dim_padded and is <= cap (so e.g. 384 stays 384, not 128)."""
    best = 128
    t = 128
    limit = min(dim_padded, cap)
    while t <= limit:
        if dim_padded % t == 0:
            best = t
        t += 128
    return best


# ------------------------- fused whole-MLP kernel ----------------------------
def _fused_mlp_kernel(num_hidden, *refs):
    """refs = (x_ref, [w_i, b_i]*num_hidden, w_head, b_head, o_ref).

    Everything (all weights + one batch tile) is resident in VMEM; the f32
    matmul results feed the next layer directly (no HBM round-trips).
    """
    x_ref = refs[0]
    o_ref = refs[-1]
    idx = 1
    h = x_ref[...]                                   # bf16 activations tile
    for _ in range(num_hidden):
        w_ref, b_ref = refs[idx], refs[idx + 1]
        idx += 2
        y = jnp.dot(h, w_ref[...], preferred_element_type=jnp.float32) + b_ref[...]
        h = jnp.maximum(y, jnp.float32(0.0)).astype(jnp.bfloat16)
    w_ref, b_ref = refs[idx], refs[idx + 1]
    o_ref[...] = jnp.dot(h, w_ref[...], preferred_element_type=jnp.float32) + b_ref[...]


def _fused_forward(x_pad, prepared, *, tm, vmem_needed):
    Mp, Kp = x_pad.shape
    w_head, b_head = prepared["head"]
    Nh = w_head.shape[1]

    in_specs = [pl.BlockSpec((tm, Kp), lambda i: (i, 0))]
    operands = [x_pad]
    for w, b in prepared["hidden"]:
        in_specs.append(pl.BlockSpec(w.shape, lambda i: (0, 0)))
        in_specs.append(pl.BlockSpec(b.shape, lambda i: (0, 0)))
        operands += [w, b]
    in_specs.append(pl.BlockSpec(w_head.shape, lambda i: (0, 0)))
    in_specs.append(pl.BlockSpec(b_head.shape, lambda i: (0, 0)))
    operands += [w_head, b_head]

    vmem_limit = int(min(max(2 * vmem_needed, 4 << 20), _MAX_VMEM_LIMIT))
    kernel = functools.partial(_fused_mlp_kernel, len(prepared["hidden"]))
    return pl.pallas_call(
        kernel,
        out_shape=jax.ShapeDtypeStruct((Mp, Nh), jnp.float32),
        grid_spec=pltpu.PrefetchScalarGridSpec(
            num_scalar_prefetch=0,
            grid=(Mp // tm,),
            in_specs=in_specs,
            out_specs=pl.BlockSpec((tm, Nh), lambda i: (i, 0)),
        ),
        compiler_params=pltpu.CompilerParams(
            dimension_semantics=("parallel",),
            vmem_limit_bytes=vmem_limit,
        ),
    )(*operands)


# ------------------------- tiled per-layer fallback --------------------------
def _linear_kernel(apply_relu, x_ref, w_ref, b_ref, o_ref, acc_ref):
    """One (tm, tn) output tile; K-tiled accumulation, bias folded into init."""
    k = pl.program_id(2)

    @pl.when(k == 0)
    def _():
        acc_ref[...] = jnp.broadcast_to(b_ref[...], acc_ref.shape)

    acc_ref[...] += jnp.dot(
        x_ref[...], w_ref[...], preferred_element_type=jnp.float32
    )

    @pl.when(k == pl.num_programs(2) - 1)
    def _():
        y = acc_ref[...]
        if apply_relu:
            y = jnp.maximum(y, jnp.float32(0.0))
        o_ref[...] = y.astype(o_ref.dtype)


def _linear_layer(x_pad, w_pad, b_pad, *, apply_relu, out_dtype, tm):
    """y = relu?(x @ W + b).  x:(Mp,Kp) bf16, W:(Kp,Np) bf16, b:(1,Np) f32."""
    Mp, Kp = x_pad.shape
    Kp_w, Np = w_pad.shape
    assert Kp == Kp_w and Mp % tm == 0

    tn = _pick_tile(Np, 512)
    tk = _pick_tile(Kp, 512)
    grid = (Mp // tm, Np // tn, Kp // tk)

    out_itemsize = jnp.dtype(out_dtype).itemsize
    vmem_needed = (
        2 * (tm * tk * 2 + tk * tn * 2 + tn * 4 + tm * tn * out_itemsize)
        + tm * tn * 4
    )
    vmem_limit = int(min(max(2 * vmem_needed, 4 << 20), _MAX_VMEM_LIMIT))

    kernel = functools.partial(_linear_kernel, apply_relu)
    return pl.pallas_call(
        kernel,
        out_shape=jax.ShapeDtypeStruct((Mp, Np), out_dtype),
        grid_spec=pltpu.PrefetchScalarGridSpec(
            num_scalar_prefetch=0,
            grid=grid,
            in_specs=[
                pl.BlockSpec((tm, tk), lambda i, j, k: (i, k)),   # activations
                pl.BlockSpec((tk, tn), lambda i, j, k: (k, j)),   # weights
                pl.BlockSpec((1, tn), lambda i, j, k: (0, j)),    # bias
            ],
            out_specs=pl.BlockSpec((tm, tn), lambda i, j, k: (i, j)),
            scratch_shapes=[pltpu.VMEM((tm, tn), jnp.float32)],
        ),
        compiler_params=pltpu.CompilerParams(
            dimension_semantics=("parallel", "parallel", "arbitrary"),
            vmem_limit_bytes=vmem_limit,
        ),
    )(x_pad, w_pad, b_pad)


# --------------------------- parameter preparation ---------------------------
def prepare_params(params, *, c, f):
    """One-time padding + bf16 cast of all weights (hoisted out of forward)."""
    hidden = []
    for w, b in params["hidden"]:
        kin, nout = w.shape
        Kp = _round_up(kin, 128)
        Np = _round_up(nout, 128)
        w_pad = (
            jnp.zeros((Kp, Np), jnp.float32).at[:kin, :nout].set(w)
        ).astype(jnp.bfloat16)
        b_pad = jnp.zeros((1, Np), jnp.float32).at[:, :nout].set(b.reshape(1, -1))
        hidden.append((w_pad, b_pad))

    wc, bc = params["outC"]
    wf, bf = params["outF"]
    H = wc.shape[0]
    Hp = _round_up(H, 128)
    Nh = _round_up(c + f, 128)
    w_head = (
        jnp.zeros((Hp, Nh), jnp.float32)
        .at[:H, :c].set(wc)
        .at[:H, c: c + f].set(wf)
    ).astype(jnp.bfloat16)
    b_head = (
        jnp.zeros((1, Nh), jnp.float32)
        .at[:, :c].set(bc.reshape(1, -1))
        .at[:, c: c + f].set(bf.reshape(1, -1))
    )
    return {"hidden": hidden, "head": (w_head, b_head)}


# ------------------------------- forward ------------------------------------
def next_word_prediction_mlp(x, prepared, *, c, f):
    """Forward pass.  x: (B, p, s, c, f) float32.  Returns (outC, outF)."""
    B = x.shape[0]
    x_flat = x.reshape(B, -1).astype(jnp.float32)        # x.view(x.size(0), -1)
    K = x_flat.shape[1]

    Kp = prepared["hidden"][0][0].shape[0]
    w_head, b_head = prepared["head"]
    Nh = w_head.shape[1]
    assert K <= Kp

    # Batch / M tile padded to multiples of 16 (bf16 sublane packing).
    tm = min(256, _round_up(B, 16))
    Mp = _round_up(B, tm)
    # v7x: make sure a multi-row batch yields >=2 parallel M blocks (2 TCs).
    if Mp // tm == 1 and Mp >= 32 and (Mp // 2) % 16 == 0:
        tm = Mp // 2

    x_pad = jnp.zeros((Mp, Kp), jnp.bfloat16).at[:B, :K].set(
        x_flat.astype(jnp.bfloat16)
    )

    # ------ fused path: all weights resident in VMEM (single pallas_call) ----
    weight_bytes = sum(w.size * 2 + b.size * 4 for w, b in prepared["hidden"])
    weight_bytes += w_head.size * 2 + b_head.size * 4
    h_max = max(w.shape[1] for w, _ in prepared["hidden"])
    vmem_needed_fused = (
        2 * (tm * Kp * 2 + tm * Nh * 4)     # double-buffered x / out tiles
        + 2 * weight_bytes                  # (conservatively) buffered weights
        + 3 * tm * h_max * 4                # intermediate activations (f32)
    )

    if vmem_needed_fused <= _FUSED_VMEM_BUDGET:
        out_head = _fused_forward(
            x_pad, prepared, tm=tm, vmem_needed=vmem_needed_fused
        )
    else:
        # ------ tiled fallback: one pallas_call per layer --------------------
        h = x_pad
        for w_pad, b_pad in prepared["hidden"]:
            h = _linear_layer(
                h, w_pad, b_pad, apply_relu=True, out_dtype=jnp.bfloat16, tm=tm
            )
        out_head = _linear_layer(
            h, w_head, b_head, apply_relu=False, out_dtype=jnp.float32, tm=tm
        )

    outc = out_head[:B, :c]          # outC.view(batchSize, c)
    outf = out_head[:B, c: c + f]    # outF.view(batchSize, f)
    return outc, outf


# --------------------------- parameter setup --------------------------------
def init_params(key, *, p, s, c, f):
    if inferencePredictiveNetworkUseInputAllProperties:
        input_size = p * s * c * f
        hidden_mult = 1
    else:
        input_size = s * c * f
        hidden_mult = 2
    hidden_size = input_size * hidden_mult

    def linear_init(k, fan_in, fan_out):
        # roughly matches nn.Linear's uniform(-1/sqrt(fan_in), 1/sqrt(fan_in))
        kw, kb = jax.random.split(k)
        bound = 1.0 / jnp.sqrt(jnp.float32(fan_in))
        w = jax.random.uniform(kw, (fan_in, fan_out), jnp.float32, -bound, bound)
        b = jax.random.uniform(kb, (1, fan_out), jnp.float32, -bound, bound)
        return w, b

    keys = jax.random.split(key, numberOfHiddenLayers + 2)
    hidden = []
    in_dim = input_size
    for l in range(numberOfHiddenLayers):
        hidden.append(linear_init(keys[l], in_dim, hidden_size))
        in_dim = hidden_size
    # inferencePredictiveNetworkIndependentFCpredictions == True branch:
    wc, bc = linear_init(keys[numberOfHiddenLayers], hidden_size, c)
    wf, bf = linear_init(keys[numberOfHiddenLayers + 1], hidden_size, f)
    return (
        {"hidden": hidden, "outC": (wc, bc), "outF": (wf, bf)},
        input_size,
        hidden_size,
    )


# -------------------------- pure-JAX reference -------------------------------
def reference_forward(x, params):
    B = x.shape[0]
    h = x.reshape(B, -1).astype(jnp.float32)
    for w, b in params["hidden"]:
        h = jnp.maximum(h @ w + b, 0.0)
    wc, bc = params["outC"]
    wf, bf = params["outF"]
    return h @ wc + bc, h @ wf + bf


# --------------------------------- main --------------------------------------
if __name__ == "__main__":
    # small database-network-like dims: p properties, s segments, c columns, f features
    B, p, s, c, f = 2, 2, 2, 4, 8   # inputSize = 2*2*4*8 = 128, hiddenSize = 128
    key = jax.random.PRNGKey(0)
    kx, kp = jax.random.split(key)

    params, input_size, hidden_size = init_params(kp, p=p, s=s, c=c, f=f)
    x = jax.random.normal(kx, (B, p, s, c, f), dtype=jnp.float32)

    # One-time weight padding / bf16 cast (hoisted out of the jitted forward).
    prepared = jax.tree_util.tree_map(
        jax.block_until_ready, prepare_params(params, c=c, f=f)
    )

    forward = jax.jit(functools.partial(next_word_prediction_mlp, c=c, f=f))
    outc, outf = forward(x, prepared)
    outc = jax.block_until_ready(outc)
    outf = jax.block_until_ready(outf)

    ref_c, ref_f = reference_forward(x, params)
    assert outc.shape == (B, c) and outf.shape == (B, f)
    # bf16 weight/activation streaming with f32 accumulation -> looser tolerance.
    assert jnp.allclose(outc, ref_c, atol=2e-2, rtol=2e-2)
    assert jnp.allclose(outf, ref_f, atol=2e-2, rtol=2e-2)

    print("KERNEL_OK")
</pallas_src>

<mosaic_0001>
module attributes {stable_mosaic.version = 11 : i64} {
  func.func @_fused_mlp_kernel(%arg0: i32, %arg1: memref<16x128xbf16, #tpu.memory_space<vmem>>, %arg2: memref<128x128xbf16, #tpu.memory_space<vmem>>, %arg3: memref<1x128xf32, #tpu.memory_space<vmem>>, %arg4: memref<128x128xbf16, #tpu.memory_space<vmem>>, %arg5: memref<1x128xf32, #tpu.memory_space<vmem>>, %arg6: memref<128x128xbf16, #tpu.memory_space<vmem>>, %arg7: memref<1x128xf32, #tpu.memory_space<vmem>>, %arg8: memref<16x128xf32, #tpu.memory_space<vmem>>) attributes {dimension_semantics = [#tpu.dimension_semantics<parallel>], iteration_bounds = array<i64: 1>, scalar_prefetch = 0 : i64, scratch_operands = 0 : i64, tpu.core_type = #tpu.core_type<tc>, window_params = [{transform_indices = @transform_0, window_bounds = array<i64: 16, 128>}, {pipeline_mode = #tpu.pipeline_mode<synchronous>, transform_indices = @transform_1, window_bounds = array<i64: 128, 128>}, {pipeline_mode = #tpu.pipeline_mode<synchronous>, transform_indices = @transform_2, window_bounds = array<i64: 1, 128>}, {pipeline_mode = #tpu.pipeline_mode<synchronous>, transform_indices = @transform_3, window_bounds = array<i64: 128, 128>}, {pipeline_mode = #tpu.pipeline_mode<synchronous>, transform_indices = @transform_4, window_bounds = array<i64: 1, 128>}, {pipeline_mode = #tpu.pipeline_mode<synchronous>, transform_indices = @transform_5, window_bounds = array<i64: 128, 128>}, {pipeline_mode = #tpu.pipeline_mode<synchronous>, transform_indices = @transform_6, window_bounds = array<i64: 1, 128>}, {transform_indices = @transform_7, window_bounds = array<i64: 16, 128>}]} {
    %c0 = arith.constant 0 : index
    %c0_0 = arith.constant 0 : index
    %0 = vector.load %arg1[%c0, %c0_0] : memref<16x128xbf16, #tpu.memory_space<vmem>>, vector<16x128xbf16>
    %c0_1 = arith.constant 0 : index
    %c0_2 = arith.constant 0 : index
    %1 = vector.load %arg2[%c0_1, %c0_2] : memref<128x128xbf16, #tpu.memory_space<vmem>>, vector<128x128xbf16>
    %cst = arith.constant dense<0.000000e+00> : vector<16x128xf32>
    %2 = tpu.matmul %0, %1, %cst {dimension_numbers = #tpu.dot_dimension_numbers<[1], [0], [0], [1], [0, 0, 1, 1], [], []>} : vector<16x128xbf16>, vector<128x128xbf16>, vector<16x128xf32> -> vector<16x128xf32>
    %c0_3 = arith.constant 0 : index
    %c0_4 = arith.constant 0 : index
    %3 = vector.load %arg3[%c0_3, %c0_4] : memref<1x128xf32, #tpu.memory_space<vmem>>, vector<1x128xf32>
    %4 = vector.broadcast %3 : vector<1x128xf32> to vector<16x128xf32>
    %5 = arith.addf %2, %4 : vector<16x128xf32>
    %cst_5 = arith.constant 0.000000e+00 : f32
    %6 = vector.broadcast %cst_5 : f32 to vector<16x128xf32>
    %7 = arith.maximumf %5, %6 : vector<16x128xf32>
    %8 = arith.truncf %7 : vector<16x128xf32> to vector<16x128xbf16>
    %c0_6 = arith.constant 0 : index
    %c0_7 = arith.constant 0 : index
    %9 = vector.load %arg4[%c0_6, %c0_7] : memref<128x128xbf16, #tpu.memory_space<vmem>>, vector<128x128xbf16>
    %cst_8 = arith.constant dense<0.000000e+00> : vector<16x128xf32>
    %10 = tpu.matmul %8, %9, %cst_8 {dimension_numbers = #tpu.dot_dimension_numbers<[1], [0], [0], [1], [0, 0, 1, 1], [], []>} : vector<16x128xbf16>, vector<128x128xbf16>, vector<16x128xf32> -> vector<16x128xf32>
    %c0_9 = arith.constant 0 : index
    %c0_10 = arith.constant 0 : index
    %11 = vector.load %arg5[%c0_9, %c0_10] : memref<1x128xf32, #tpu.memory_space<vmem>>, vector<1x128xf32>
    %12 = vector.broadcast %11 : vector<1x128xf32> to vector<16x128xf32>
    %13 = arith.addf %10, %12 : vector<16x128xf32>
    %cst_11 = arith.constant 0.000000e+00 : f32
    %14 = vector.broadcast %cst_11 : f32 to vector<16x128xf32>
    %15 = arith.maximumf %13, %14 : vector<16x128xf32>
    %16 = arith.truncf %15 : vector<16x128xf32> to vector<16x128xbf16>
    %c0_12 = arith.constant 0 : index
    %c0_13 = arith.constant 0 : index
    %17 = vector.load %arg6[%c0_12, %c0_13] : memref<128x128xbf16, #tpu.memory_space<vmem>>, vector<128x128xbf16>
    %cst_14 = arith.constant dense<0.000000e+00> : vector<16x128xf32>
    %18 = tpu.matmul %16, %17, %cst_14 {dimension_numbers = #tpu.dot_dimension_numbers<[1], [0], [0], [1], [0, 0, 1, 1], [], []>} : vector<16x128xbf16>, vector<128x128xbf16>, vector<16x128xf32> -> vector<16x128xf32>
    %c0_15 = arith.constant 0 : index
    %c0_16 = arith.constant 0 : index
    %19 = vector.load %arg7[%c0_15, %c0_16] : memref<1x128xf32, #tpu.memory_space<vmem>>, vector<1x128xf32>
    %20 = vector.broadcast %19 : vector<1x128xf32> to vector<16x128xf32>
    %21 = arith.addf %18, %20 : vector<16x128xf32>
    %c0_17 = arith.constant 0 : index
    %c0_18 = arith.constant 0 : index
    %22 = vector.load %arg8[%c0_17, %c0_18] : memref<16x128xf32, #tpu.memory_space<vmem>>, vector<16x128xf32>
    tpu.vector_store %arg8[%c0_17, %c0_18], %21 {strides = array<i32>} : memref<16x128xf32, #tpu.memory_space<vmem>>, vector<16x128xf32>,
    return
  }
  func.func @transform_0(%arg0: i32) -> (i32, i32) {
    %c0_i32 = arith.constant 0 : i32
    %c0_i32_0 = arith.constant 0 : i32
    return %arg0, %c0_i32 : i32, i32
  }
  func.func @transform_1(%arg0: i32) -> (i32, i32) {
    %c0_i32 = arith.constant 0 : i32
    %c0_i32_0 = arith.constant 0 : i32
    %c0_i32_1 = arith.constant 0 : i32
    return %c0_i32, %c0_i32_0 : i32, i32
  }
  func.func @transform_2(%arg0: i32) -> (i32, i32) {
    %c0_i32 = arith.constant 0 : i32
    %c0_i32_0 = arith.constant 0 : i32
    %c0_i32_1 = arith.constant 0 : i32
    return %c0_i32, %c0_i32_0 : i32, i32
  }
  func.func @transform_3(%arg0: i32) -> (i32, i32) {
    %c0_i32 = arith.constant 0 : i32
    %c0_i32_0 = arith.constant 0 : i32
    %c0_i32_1 = arith.constant 0 : i32
    return %c0_i32, %c0_i32_0 : i32, i32
  }
  func.func @transform_4(%arg0: i32) -> (i32, i32) {
    %c0_i32 = arith.constant 0 : i32
    %c0_i32_0 = arith.constant 0 : i32
    %c0_i32_1 = arith.constant 0 : i32
    return %c0_i32, %c0_i32_0 : i32, i32
  }
  func.func @transform_5(%arg0: i32) -> (i32, i32) {
    %c0_i32 = arith.constant 0 : i32
    %c0_i32_0 = arith.constant 0 : i32
    %c0_i32_1 = arith.constant 0 : i32
    return %c0_i32, %c0_i32_0 : i32, i32
  }
  func.func @transform_6(%arg0: i32) -> (i32, i32) {
    %c0_i32 = arith.constant 0 : i32
    %c0_i32_0 = arith.constant 0 : i32
    %c0_i32_1 = arith.constant 0 : i32
    return %c0_i32, %c0_i32_0 : i32, i32
  }
  func.func @transform_7(%arg0: i32) -> (i32, i32) {
    %c0_i32 = arith.constant 0 : i32
    %c0_i32_0 = arith.constant 0 : i32
    return %arg0, %c0_i32 : i32, i32
  }
}

</mosaic_0001>

<bundles_post_ra>
// kernel: next_word_prediction_mlp.1
= control target key start
LH: loop header
LB: loop body
LE: loop exit
PB: predicated region body
PF: predicated region fallthrough
CT: control target
= control target key end

     0   :  { %12 = vsyncpa [#allocation3], 0  ;;  %s749_s0 = inlined_call_operand.vmem [shape: bf16[16,128], index: 0, kind: input, shape index: {}]   ;;  %s750_s1 = inlined_call_operand.vmem [shape: bf16[128,128], index: 1, kind: input, shape index: {}]   ;;  %s751_s2 = inlined_call_operand.vmem [shape: f32[1,128], index: 2, kind: input, shape index: {}]   ;;  %s752_s3 = inlined_call_operand.hbm [shape: bf16[128,128], index: 3, kind: input, shape index: {}]   ;;  %s753_s4 = inlined_call_operand.vmem [shape: f32[1,128], index: 4, kind: input, shape index: {}]   ;;  %s754_s5 = inlined_call_operand.hbm [shape: bf16[128,128], index: 5, kind: input, shape index: {}]   ;;  %s755_s6 = inlined_call_operand.vmem [shape: f32[1,128], index: 6, kind: input, shape index: {}]   ;;  %s756_s7 = inlined_call_operand.vmem [shape: f32[16,128], index: 7, kind: output, shape index: {}]  }
   0x1   :  { %13 = vsyncpa [#allocation5], 0  ;;  %s607_s24 = smov [#allocation2]   ;;  %s559_s28 = scalar_lea.hbm %s752_s3, 1024 }
   0x2   :  { %s25_s25 = sshll.u32 %s607_s24, 4  ;;  %p560_p0 = scmp.ne.s32.totalorder %s752_s3, %s559_s28  ;;  %s26_s25 = int_to_ptr.vmem [resolvable:$true] %s25_s25 }
   0x3   :  { %p563_p1 = scmp.lt.u32.totalorder %s559_s28, %s752_s3 }
   0x5   :  { %p565_p2 = pnand %p563_p1, %p560_p0 }
   0x7   :  { %568 = shalt.err (!%p565_p2)
}
   0x8   :  { %s569_s10 = scalar_lea.vmem %s26_s25, 1024  ;;  %p574_p4 = scmp.lt.s32.totalorder %s26_s25, %s26_s25 }
   0x9   :  { %p570_p3 = scmp.ne.s32.totalorder %s26_s25, %s569_s10  ;;  %p575_p5 = scmp.lt.s32.totalorder %s569_s10, %s569_s10 }
   0xb   :  { %p576_p6 = por %p575_p5, %p574_p4 }
   0xd   :  { %p577_p7 = pnand %p576_p6, %p570_p3 }
   0xf   :  { %580 = shalt.err (!%p577_p7)
}
  0x10   :  { %s608_s11 = smov 64   ;;  %s609_s12 = smov 4  }
  0x11   :  { %31 = dma.hbm_to_vmem [thread:$0]  %s752_s3, 1024, %s26_s25, [#allocation3], %s608_s11, %s608_s11, %s609_s12  }
  0x12   :  { %s610_s15 = smov [#allocation4]   ;;  %s581_s19 = scalar_lea.hbm %s754_s5, 1024 }
  0x13   :  { %s39_s16 = sshll.u32 %s610_s15, 4  ;;  %p582_p8 = scmp.ne.s32.totalorder %s754_s5, %s581_s19  ;;  %s40_s16 = int_to_ptr.vmem [resolvable:$true] %s39_s16 }
  0x14   :  { %p585_p9 = scmp.lt.u32.totalorder %s581_s19, %s754_s5 }
  0x16   :  { %p587_p10 = pnand %p585_p9, %p582_p8 }
  0x18   :  { %590 = shalt.err (!%p587_p10)
}
  0x19   :  { %s591_s24 = scalar_lea.vmem %s40_s16, 1024  ;;  %p596_p12 = scmp.lt.s32.totalorder %s40_s16, %s40_s16 }
  0x1a   :  { %p592_p11 = scmp.ne.s32.totalorder %s40_s16, %s591_s24  ;;  %p597_p13 = scmp.lt.s32.totalorder %s591_s24, %s591_s24 }
  0x1c   :  { %p598_p0 = por %p597_p13, %p596_p12 }
  0x1e   :  { %p599_p1 = pnand %p598_p0, %p592_p11 }
  0x20   :  { %602 = shalt.err (!%p599_p1)
}
  0x21   :  { %45 = dma.hbm_to_vmem [thread:$0]  %s754_s5, 1024, %s40_s16, [#allocation5], %s608_s11, %s608_s11, %s609_s12  }
  0x22   :  { %603 = dma.done.wait [#allocation3], 1024  }
  0x23   :  { %604 = vsyncadd [#allocation3], 4294966272 }
  0x24   :  { %605 = dma.done.wait [#allocation5], 1024  }
  0x25   :  { %606 = vsyncadd [#allocation5], 4294966272  ;;  %v611_v0 = vmov 0.0   ;;  %vm612_vm0 = vmmov 0   ;;  %v534_v1 = vld [vmem:[%s750_s1] sm:$0xff]   ;;  %v535_v2 = vld [vmem:[%s750_s1 + $0x8] sm:$0xff]  }
  0x26   :  { %468 = vmatprep.subr.bf16.mxu0 %v611_v0  ;;  %484 = vmatprep.mubr.msk.bf16.mxu0 %vm612_vm0, %v611_v0  ;;  %v536_v3 = vld [vmem:[%s750_s1 + $0x10] sm:$0xff]   ;;  %v543_v4 = vld [vmem:[#allocation2] sm:$0xff]   ;;  %v537_v5 = vld [vmem:[%s750_s1 + $0x18] sm:$0xff]  }
  0x27   :  { %488 = vmatprep.subr.bf16.mxu1 %v611_v0  ;;  %504 = vmatprep.mubr.msk.bf16.mxu1 %vm612_vm0, %v611_v0  ;;  %v544_v6 = vld [vmem:[#allocation2 + $0x8] sm:$0xff]   ;;  %v538_v7 = vld [vmem:[%s750_s1 + $0x20] sm:$0xff]   ;;  %v545_v8 = vld [vmem:[#allocation2 + $0x10] sm:$0xff]  }
  0x28   :  { %469 = vmatpush3.bf16.msra.mxu0 %v534_v1  ;;  %489 = vmatpush3.bf16.msra.mxu1 %v543_v4  ;;  %v539_v9 = vld [vmem:[%s750_s1 + $0x28] sm:$0xff]   ;;  %v546_v10 = vld [vmem:[#allocation2 + $0x18] sm:$0xff]   ;;  %v540_v11 = vld [vmem:[%s750_s1 + $0x30] sm:$0xff]  }
  0x29   :  { %470 = vmatprep.subr.bf16.mxu0 %v611_v0  ;;  %490 = vmatprep.subr.bf16.mxu1 %v611_v0  ;;  %v547_v12 = vld [vmem:[#allocation2 + $0x20] sm:$0xff]   ;;  %v541_v13 = vld [vmem:[%s750_s1 + $0x38] sm:$0xff]   ;;  %v548_v14 = vld [vmem:[#allocation2 + $0x28] sm:$0xff]  }
  0x2a   :  { %v542_v15 = vld [vmem:[%s749_s0] sm:$0xff]   ;;  %v549_v16 = vld [vmem:[#allocation2 + $0x30] sm:$0xff]   ;;  %v550_v17 = vld [vmem:[#allocation2 + $0x38] sm:$0xff]  }
  0x2b   :  { %v551_v18 = vld [vmem:[#allocation4] sm:$0xff]   ;;  %v552_v19 = vld [vmem:[#allocation4 + $0x8] sm:$0xff]   ;;  %v553_v20 = vld [vmem:[#allocation4 + $0x10] sm:$0xff]  }
  0x2c   :  { %471 = vmatpush3.bf16.msra.mxu0 %v535_v2  ;;  %491 = vmatpush3.bf16.msra.mxu1 %v544_v6  ;;  %v554_v21 = vld [vmem:[#allocation4 + $0x18] sm:$0xff]   ;;  %v555_v22 = vld [vmem:[#allocation4 + $0x20] sm:$0xff]   ;;  %v556_v23 = vld [vmem:[#allocation4 + $0x28] sm:$0xff]  }
  0x2d   :  { %472 = vmatprep.subr.bf16.mxu0 %v611_v0  ;;  %492 = vmatprep.subr.bf16.mxu1 %v611_v0  ;;  %v413_v24 = vld [vmem:[%s751_s2] ss:$0 sm:$0xff]  ;;  %v557_v34 = vld [vmem:[#allocation4 + $0x30] sm:$0xff]   ;;  %v558_v35 = vld [vmem:[#allocation4 + $0x38] sm:$0xff]  }
  0x2e   :  { %v423_v36 = vld [vmem:[%s753_s4] ss:$0 sm:$0xff] }
  0x2f   :  { %v432_v46 = vld [vmem:[%s755_s6] ss:$0 sm:$0xff] }
  0x30   :  { %473 = vmatpush3.bf16.msra.mxu0 %v536_v3  ;;  %493 = vmatpush3.bf16.msra.mxu1 %v545_v8 }
  0x31   :  { %474 = vmatprep.subr.bf16.mxu0 %v611_v0  ;;  %494 = vmatprep.subr.bf16.mxu1 %v611_v0 }
  0x34   :  { %475 = vmatpush3.bf16.msra.mxu0 %v537_v5  ;;  %495 = vmatpush3.bf16.msra.mxu1 %v546_v10 }
  0x35   :  { %476 = vmatprep.subr.bf16.mxu0 %v611_v0  ;;  %496 = vmatprep.subr.bf16.mxu1 %v611_v0 }
  0x38   :  { %477 = vmatpush3.bf16.msra.mxu0 %v538_v7  ;;  %497 = vmatpush3.bf16.msra.mxu1 %v547_v12 }
  0x39   :  { %478 = vmatprep.subr.bf16.mxu0 %v611_v0  ;;  %498 = vmatprep.subr.bf16.mxu1 %v611_v0 }
  0x3c   :  { %479 = vmatpush3.bf16.msra.mxu0 %v539_v9  ;;  %499 = vmatpush3.bf16.msra.mxu1 %v548_v14 }
  0x3d   :  { %480 = vmatprep.subr.bf16.mxu0 %v611_v0  ;;  %500 = vmatprep.subr.bf16.mxu1 %v611_v0 }
  0x40   :  { %481 = vmatpush3.bf16.msra.mxu0 %v540_v11  ;;  %501 = vmatpush3.bf16.msra.mxu1 %v549_v16 }
  0x41   :  { %482 = vmatprep.subr.bf16.mxu0 %v611_v0  ;;  %502 = vmatprep.subr.bf16.mxu1 %v611_v0 }
  0x44   :  { %483 = vmatpush3.bf16.msra.mxu0 %v541_v13  ;;  %503 = vmatpush3.bf16.msra.mxu1 %v550_v17 }
  0x45   :  { %508 = vmatprep.subr.bf16.mxu0 %v611_v0 }
  0x47   :  { %485 = vmatmul.mubr.bf16.vlgmr.msra.gmra.mrb[0].mxu0 %v542_v15 }
  0x48   :  { %524 = vmatprep.mubr.msk.bf16.mxu0 %vm612_vm0, %v611_v0  ;;  %509 = vmatpush3.bf16.msra.mxu0 %v551_v18 }
  0x49   :  { %510 = vmatprep.subr.bf16.mxu0 %v611_v0 }
  0x4c   :  { %511 = vmatpush3.bf16.msra.mxu0 %v552_v19 }
  0x4d   :  { %512 = vmatprep.subr.bf16.mxu0 %v611_v0 }
  0x50   :  { %513 = vmatpush3.bf16.msra.mxu0 %v553_v20 }
  0x51   :  { %514 = vmatprep.subr.bf16.mxu0 %v611_v0 }
  0x54   :  { %515 = vmatpush3.bf16.msra.mxu0 %v554_v21 }
  0x55   :  { %516 = vmatprep.subr.bf16.mxu0 %v611_v0 }
  0x58   :  { %517 = vmatpush3.bf16.msra.mxu0 %v555_v22 }
  0x59   :  { %518 = vmatprep.subr.bf16.mxu0 %v611_v0 }
  0x5c   :  { %519 = vmatpush3.bf16.msra.mxu0 %v556_v23 }
  0x5d   :  { %520 = vmatprep.subr.bf16.mxu0 %v611_v0 }
  0x60   :  { %521 = vmatpush3.bf16.msra.mxu0 %v557_v34 }
  0x61   :  { %522 = vmatprep.subr.bf16.mxu0 %v611_v0 }
  0x64   :  { %523 = vmatpush3.bf16.msra.mxu0 %v558_v35 }
 0x11a   :  { %v168_v25 = vpop.f32.mrb[0].mxu0 }
 0x11b   :  { %v169_v26 = vadd.f32 %v413_v24, %v168_v25  ;;  %v486_v27 = vpop.f32.mrb[1].mxu0 }
 0x11c   :  { %v171_v28 = vpop.f32.mrb[2].mxu0 }
 0x11d   :  { %v172_v29 = vadd.f32 %v413_v24, %v171_v28  ;;  %v487_v30 = vpop.f32.mrb[3].mxu0  ;;  %v175_v31 = vmax.f32 %v169_v26, 0.0 }
 0x11f   :  { %v176_v32 = vmax.f32 %v172_v29, 0.0 }
 0x121   :  { %v177_v33 = vpack.c.bf16 %v176_v32, %v175_v31 }
 0x123   :  { %505 = vmatmul.mubr.bf16.vlgmr.msra.gmra.mrb[0].mxu1 %v177_v33 }
 0x1f6   :  { %v283_v37 = vpop.f32.mrb[0].mxu1 }
 0x1f7   :  { %v284_v38 = vadd.f32 %v423_v36, %v283_v37  ;;  %v506_v39 = vpop.f32.mrb[1].mxu1 }
 0x1f8   :  { %v286_v40 = vpop.f32.mrb[2].mxu1 }
 0x1f9   :  { %v287_v41 = vadd.f32 %v423_v36, %v286_v40  ;;  %v507_v42 = vpop.f32.mrb[3].mxu1  ;;  %v290_v43 = vmax.f32 %v284_v38, 0.0 }
 0x1fb   :  { %v291_v44 = vmax.f32 %v287_v41, 0.0 }
 0x1fd   :  { %v292_v45 = vpack.c.bf16 %v291_v44, %v290_v43 }
 0x1ff   :  { %525 = vmatmul.mubr.bf16.vlgmr.msra.gmra.mrb[4].mxu0 %v292_v45 }
 0x2d2   :  { %v398_v47 = vpop.f32.mrb[4].mxu0 }
 0x2d3   :  { %v399_v48 = vadd.f32 %v432_v46, %v398_v47  ;;  %v526_v49 = vpop.f32.mrb[5].mxu0 }
 0x2d4   :  { %v401_v50 = vpop.f32.mrb[6].mxu0 }
 0x2d5   :  { %405 = vst [vmem:[%s756_s7] sm:$0xff] %v399_v48  ;;  %v402_v51 = vadd.f32 %v432_v46, %v401_v50  ;;  %v527_v52 = vpop.f32.mrb[7].mxu0 }
 0x2d7   :  { %406 = vst [vmem:[%s756_s7 + $0x8] sm:$0xff] %v402_v51 }
 0x2d8   :  { %411 = vsyncpa [#allocation3], 1 }
 0x2d9   :  { %412 = vsyncpa [#allocation5], 1 }

</bundles_post_ra>
